<compile_context>
chip_gen: v6e
topology: v6e:2x2x1
jax: 0.10.0
libtpu: 0.0.40
codegen_flags: <defaults>
</compile_context>

<pallas_src>
import functools

import jax
import jax.numpy as jnp
from jax.experimental import pallas as pl
from jax.experimental.pallas import tpu as pltpu


def _conv_silu_kernel(x_ref, w_ref, b_ref, m_ref, o_ref, *, k, p, d, W, OHW):
    """Fused stride-1 'same' conv + bias + SiLU for one image.

    x_ref: (1, C1, L)      H-padded, row-flattened image (+p flat pad each end)
    w_ref: (k*k, C2, C1)   per-tap weight slabs, tap index t = ky*k + kx
    b_ref: (C2, 1)         bias
    m_ref: (k, 1, OHW)     per-kx column-validity masks (0/1, f32)
    o_ref: (1, C2, OHW)    output (lane-dense: OHW is a multiple of 128 here)
    """
    C2 = o_ref.shape[1]
    acc = jnp.zeros((C2, OHW), jnp.float32)
    for ky in range(k):
        for kx in range(k):
            off = d * (ky * W + kx)
            xs = x_ref[0, :, pl.ds(off, OHW)]          # (C1, OHW) shifted window
            # Statically skip the mask when every output column reads a valid
            # (non-W-padding) input column for this kx tap.
            if kx * d != p:
                xs = xs * m_ref[kx]                    # kill wrap-around columns
            acc = acc + jnp.dot(w_ref[ky * k + kx], xs,
                                preferred_element_type=jnp.float32)
    acc = acc + b_ref[...]
    # SiLU: x * sigmoid(x); exp -> EUP, approx reciprocal -> EUP (VALU stays free).
    sig = pl.reciprocal(1.0 + jnp.exp(-acc), approx=True)
    o_ref[0] = (acc * sig).astype(o_ref.dtype)


@functools.partial(jax.jit, static_argnames=("k", "p", "s", "d"))
def conv2d_silu(x, weight, bias, *, k, p, s, d):
    """x: [N, C1, H, W] f32; weight: [C2, C1, k, k]; bias: [C2]. Returns NCHW."""
    N, C1, H, W = x.shape
    C2 = weight.shape[0]
    if s != 1 or 2 * p != d * (k - 1):
        # TODO(synk): general stride/padding needs a strided window decomposition;
        # the module config here (k=3, p=1, s=1, d=1) and the default (k=1, p=0)
        # are both stride-1 'same' convs and are fully covered.
        raise NotImplementedError("fused kernel assumes a stride-1 'same' conv")
    OH, OW = H, W
    OHW = OH * OW
    Hp = H + 2 * p
    L = Hp * W + 2 * p

    # Pad H physically, flatten rows, add p flat elements on each end so every
    # tap window is an in-bounds contiguous lane slice (tiny copies only; no
    # k*k im2col inflation and no transposes).
    xf = jnp.pad(x, ((0, 0), (0, 0), (p, p), (0, 0))).reshape(N, C1, Hp * W)
    xf = jnp.pad(xf, ((0, 0), (0, 0), (p, p)))                      # (N, C1, L)

    # Per-tap weight slabs (C2, C1), tap index t = ky*k + kx.
    w_taps = jnp.transpose(weight, (2, 3, 0, 1)).reshape(k * k, C2, C1)
    b2 = bias.reshape(C2, 1).astype(jnp.float32)

    # Static per-kx masks: flattened column ow is valid for tap kx iff
    # 0 <= (ow mod OW) + kx*d - p < W (i.e. the conv would not read W-padding).
    ow_idx = jnp.arange(OHW, dtype=jnp.int32) % OW
    xoff = jnp.arange(k, dtype=jnp.int32) * d - p
    col = ow_idx[None, :] + xoff[:, None]
    masks = ((col >= 0) & (col < W)).astype(jnp.float32).reshape(k, 1, OHW)

    kernel = functools.partial(_conv_silu_kernel, k=k, p=p, d=d, W=W, OHW=OHW)

    out_flat = pl.pallas_call(
        kernel,
        out_shape=jax.ShapeDtypeStruct((N, C2, OHW), x.dtype),
        grid_spec=pltpu.PrefetchScalarGridSpec(
            num_scalar_prefetch=0,
            grid=(N,),                                   # one image per step
            in_specs=[
                pl.BlockSpec((1, C1, L), lambda n: (n, 0, 0)),
                pl.BlockSpec((k * k, C2, C1), lambda n: (0, 0, 0)),
                pl.BlockSpec((C2, 1), lambda n: (0, 0)),
                pl.BlockSpec((k, 1, OHW), lambda n: (0, 0, 0)),
            ],
            out_specs=pl.BlockSpec((1, C2, OHW), lambda n: (n, 0, 0)),
        ),
        compiler_params=pltpu.CompilerParams(
            dimension_semantics=("parallel",)),           # 2 TCs on v7x
    )(xf, w_taps, b2, masks)

    return out_flat.reshape(N, C2, OH, OW)                # already NCHW; free reshape


if __name__ == "__main__":
    # Module hyperparameters (non-depthwise branch, bias=True since norm_type='')
    c1, c2, k, p, s, d = 4, 8, 3, 1, 1, 1

    key = jax.random.PRNGKey(0)
    kx_, kw_, kb_ = jax.random.split(key, 3)

    # PyTorch Conv2d parameter shapes: weight [C2, C1, k, k], bias [C2]
    fan_in = c1 * k * k
    bound = 1.0 / (fan_in ** 0.5)
    weight = jax.random.uniform(kw_, (c2, c1, k, k), jnp.float32, -bound, bound)
    bias = jax.random.uniform(kb_, (c2,), jnp.float32, -bound, bound)

    x = jax.random.normal(kx_, (2, c1, 16, 16), jnp.float32)

    out = conv2d_silu(x, weight, bias, k=k, p=p, s=s, d=d)
    out = jax.block_until_ready(out)
    assert out.shape == (2, c2, 16, 16), out.shape

    # In-script reference (XLA conv + exact SiLU).  Tolerance is loosened a bit
    # because the kernel uses the EUP approximate reciprocal inside sigmoid.
    ref = jax.lax.conv_general_dilated(
        x, weight, window_strides=(s, s), padding=[(p, p), (p, p)],
        rhs_dilation=(d, d), dimension_numbers=("NCHW", "OIHW", "NCHW"))
    ref = ref + bias.reshape(1, c2, 1, 1)
    ref = ref * jax.nn.sigmoid(ref)
    assert jnp.allclose(out, ref, atol=2e-2, rtol=2e-2), \
        float(jnp.max(jnp.abs(out - ref)))

    print("KERNEL_OK")
</pallas_src>

<mosaic_0001>
module attributes {stable_mosaic.version = 11 : i64} {
  func.func @_conv_silu_kernel(%arg0: i32, %arg1: memref<1x4x290xf32, #tpu.memory_space<vmem>>, %arg2: memref<9x8x4xf32, #tpu.memory_space<vmem>>, %arg3: memref<8x1xf32, #tpu.memory_space<vmem>>, %arg4: memref<3x1x256xf32, #tpu.memory_space<vmem>>, %arg5: memref<1x8x256xf32, #tpu.memory_space<vmem>>) attributes {dimension_semantics = [#tpu.dimension_semantics<parallel>], iteration_bounds = array<i64: 2>, scalar_prefetch = 0 : i64, scratch_operands = 0 : i64, tpu.core_type = #tpu.core_type<tc>, window_params = [{transform_indices = @transform_0, window_bounds = array<i64: 1, 4, 290>}, {pipeline_mode = #tpu.pipeline_mode<synchronous>, transform_indices = @transform_1, window_bounds = array<i64: 9, 8, 4>}, {pipeline_mode = #tpu.pipeline_mode<synchronous>, transform_indices = @transform_2, window_bounds = array<i64: 8, 1>}, {pipeline_mode = #tpu.pipeline_mode<synchronous>, transform_indices = @transform_3, window_bounds = array<i64: 3, 1, 256>}, {transform_indices = @transform_4, window_bounds = array<i64: 1, 8, 256>}]} {
    %cst = arith.constant 0.000000e+00 : f32
    %0 = vector.broadcast %cst : f32 to vector<8x256xf32>
    %c0 = arith.constant 0 : index
    %c0_0 = arith.constant 0 : index
    %c0_1 = arith.constant 0 : index
    %1 = vector.load %arg1[%c0, %c0_0, %c0_1] : memref<1x4x290xf32, #tpu.memory_space<vmem>>, vector<1x4x256xf32>
    %2 = vector.shape_cast %1 : vector<1x4x256xf32> to vector<4x256xf32>
    %c0_2 = arith.constant 0 : index
    %c0_3 = arith.constant 0 : index
    %c0_4 = arith.constant 0 : index
    %3 = vector.load %arg4[%c0_2, %c0_3, %c0_4] : memref<3x1x256xf32, #tpu.memory_space<vmem>>, vector<1x1x256xf32>
    %4 = vector.shape_cast %3 : vector<1x1x256xf32> to vector<1x256xf32>
    %5 = vector.broadcast %4 : vector<1x256xf32> to vector<4x256xf32>
    %6 = arith.mulf %2, %5 : vector<4x256xf32>
    %c0_5 = arith.constant 0 : index
    %c0_6 = arith.constant 0 : index
    %c0_7 = arith.constant 0 : index
    %7 = vector.load %arg2[%c0_5, %c0_6, %c0_7] : memref<9x8x4xf32, #tpu.memory_space<vmem>>, vector<1x8x4xf32>
    %8 = vector.shape_cast %7 : vector<1x8x4xf32> to vector<8x4xf32>
    %cst_8 = arith.constant dense<0.000000e+00> : vector<8x256xf32>
    %9 = tpu.matmul %8, %6, %cst_8 {dimension_numbers = #tpu.dot_dimension_numbers<[1], [0], [0], [1], [0, 0, 1, 1], [], []>} : vector<8x4xf32>, vector<4x256xf32>, vector<8x256xf32> -> vector<8x256xf32>
    %10 = arith.addf %0, %9 : vector<8x256xf32>
    %c0_9 = arith.constant 0 : index
    %c0_10 = arith.constant 0 : index
    %c1 = arith.constant 1 : index
    %11 = vector.load %arg1[%c0_9, %c0_10, %c1] : memref<1x4x290xf32, #tpu.memory_space<vmem>>, vector<1x4x256xf32>
    %12 = vector.shape_cast %11 : vector<1x4x256xf32> to vector<4x256xf32>
    %c1_11 = arith.constant 1 : index
    %c0_12 = arith.constant 0 : index
    %c0_13 = arith.constant 0 : index
    %13 = vector.load %arg2[%c1_11, %c0_12, %c0_13] : memref<9x8x4xf32, #tpu.memory_space<vmem>>, vector<1x8x4xf32>
    %14 = vector.shape_cast %13 : vector<1x8x4xf32> to vector<8x4xf32>
    %cst_14 = arith.constant dense<0.000000e+00> : vector<8x256xf32>
    %15 = tpu.matmul %14, %12, %cst_14 {dimension_numbers = #tpu.dot_dimension_numbers<[1], [0], [0], [1], [0, 0, 1, 1], [], []>} : vector<8x4xf32>, vector<4x256xf32>, vector<8x256xf32> -> vector<8x256xf32>
    %16 = arith.addf %10, %15 : vector<8x256xf32>
    %c0_15 = arith.constant 0 : index
    %c0_16 = arith.constant 0 : index
    %c2 = arith.constant 2 : index
    %17 = vector.load %arg1[%c0_15, %c0_16, %c2] : memref<1x4x290xf32, #tpu.memory_space<vmem>>, vector<1x4x256xf32>
    %18 = vector.shape_cast %17 : vector<1x4x256xf32> to vector<4x256xf32>
    %c2_17 = arith.constant 2 : index
    %c0_18 = arith.constant 0 : index
    %c0_19 = arith.constant 0 : index
    %19 = vector.load %arg4[%c2_17, %c0_18, %c0_19] : memref<3x1x256xf32, #tpu.memory_space<vmem>>, vector<1x1x256xf32>
    %20 = vector.shape_cast %19 : vector<1x1x256xf32> to vector<1x256xf32>
    %21 = vector.broadcast %20 : vector<1x256xf32> to vector<4x256xf32>
    %22 = arith.mulf %18, %21 : vector<4x256xf32>
    %c2_20 = arith.constant 2 : index
    %c0_21 = arith.constant 0 : index
    %c0_22 = arith.constant 0 : index
    %23 = vector.load %arg2[%c2_20, %c0_21, %c0_22] : memref<9x8x4xf32, #tpu.memory_space<vmem>>, vector<1x8x4xf32>
    %24 = vector.shape_cast %23 : vector<1x8x4xf32> to vector<8x4xf32>
    %cst_23 = arith.constant dense<0.000000e+00> : vector<8x256xf32>
    %25 = tpu.matmul %24, %22, %cst_23 {dimension_numbers = #tpu.dot_dimension_numbers<[1], [0], [0], [1], [0, 0, 1, 1], [], []>} : vector<8x4xf32>, vector<4x256xf32>, vector<8x256xf32> -> vector<8x256xf32>
    %26 = arith.addf %16, %25 : vector<8x256xf32>
    %c0_24 = arith.constant 0 : index
    %c0_25 = arith.constant 0 : index
    %c16 = arith.constant 16 : index
    %27 = vector.load %arg1[%c0_24, %c0_25, %c16] : memref<1x4x290xf32, #tpu.memory_space<vmem>>, vector<1x4x256xf32>
    %28 = vector.shape_cast %27 : vector<1x4x256xf32> to vector<4x256xf32>
    %c0_26 = arith.constant 0 : index
    %c0_27 = arith.constant 0 : index
    %c0_28 = arith.constant 0 : index
    %29 = vector.load %arg4[%c0_26, %c0_27, %c0_28] : memref<3x1x256xf32, #tpu.memory_space<vmem>>, vector<1x1x256xf32>
    %30 = vector.shape_cast %29 : vector<1x1x256xf32> to vector<1x256xf32>
    %31 = vector.broadcast %30 : vector<1x256xf32> to vector<4x256xf32>
    %32 = arith.mulf %28, %31 : vector<4x256xf32>
    %c3 = arith.constant 3 : index
    %c0_29 = arith.constant 0 : index
    %c0_30 = arith.constant 0 : index
    %33 = vector.load %arg2[%c3, %c0_29, %c0_30] : memref<9x8x4xf32, #tpu.memory_space<vmem>>, vector<1x8x4xf32>
    %34 = vector.shape_cast %33 : vector<1x8x4xf32> to vector<8x4xf32>
    %cst_31 = arith.constant dense<0.000000e+00> : vector<8x256xf32>
    %35 = tpu.matmul %34, %32, %cst_31 {dimension_numbers = #tpu.dot_dimension_numbers<[1], [0], [0], [1], [0, 0, 1, 1], [], []>} : vector<8x4xf32>, vector<4x256xf32>, vector<8x256xf32> -> vector<8x256xf32>
    %36 = arith.addf %26, %35 : vector<8x256xf32>
    %c0_32 = arith.constant 0 : index
    %c0_33 = arith.constant 0 : index
    %c17 = arith.constant 17 : index
    %37 = vector.load %arg1[%c0_32, %c0_33, %c17] : memref<1x4x290xf32, #tpu.memory_space<vmem>>, vector<1x4x256xf32>
    %38 = vector.shape_cast %37 : vector<1x4x256xf32> to vector<4x256xf32>
    %c4 = arith.constant 4 : index
    %c0_34 = arith.constant 0 : index
    %c0_35 = arith.constant 0 : index
    %39 = vector.load %arg2[%c4, %c0_34, %c0_35] : memref<9x8x4xf32, #tpu.memory_space<vmem>>, vector<1x8x4xf32>
    %40 = vector.shape_cast %39 : vector<1x8x4xf32> to vector<8x4xf32>
    %cst_36 = arith.constant dense<0.000000e+00> : vector<8x256xf32>
    %41 = tpu.matmul %40, %38, %cst_36 {dimension_numbers = #tpu.dot_dimension_numbers<[1], [0], [0], [1], [0, 0, 1, 1], [], []>} : vector<8x4xf32>, vector<4x256xf32>, vector<8x256xf32> -> vector<8x256xf32>
    %42 = arith.addf %36, %41 : vector<8x256xf32>
    %c0_37 = arith.constant 0 : index
    %c0_38 = arith.constant 0 : index
    %c18 = arith.constant 18 : index
    %43 = vector.load %arg1[%c0_37, %c0_38, %c18] : memref<1x4x290xf32, #tpu.memory_space<vmem>>, vector<1x4x256xf32>
    %44 = vector.shape_cast %43 : vector<1x4x256xf32> to vector<4x256xf32>
    %c2_39 = arith.constant 2 : index
    %c0_40 = arith.constant 0 : index
    %c0_41 = arith.constant 0 : index
    %45 = vector.load %arg4[%c2_39, %c0_40, %c0_41] : memref<3x1x256xf32, #tpu.memory_space<vmem>>, vector<1x1x256xf32>
    %46 = vector.shape_cast %45 : vector<1x1x256xf32> to vector<1x256xf32>
    %47 = vector.broadcast %46 : vector<1x256xf32> to vector<4x256xf32>
    %48 = arith.mulf %44, %47 : vector<4x256xf32>
    %c5 = arith.constant 5 : index
    %c0_42 = arith.constant 0 : index
    %c0_43 = arith.constant 0 : index
    %49 = vector.load %arg2[%c5, %c0_42, %c0_43] : memref<9x8x4xf32, #tpu.memory_space<vmem>>, vector<1x8x4xf32>
    %50 = vector.shape_cast %49 : vector<1x8x4xf32> to vector<8x4xf32>
    %cst_44 = arith.constant dense<0.000000e+00> : vector<8x256xf32>
    %51 = tpu.matmul %50, %48, %cst_44 {dimension_numbers = #tpu.dot_dimension_numbers<[1], [0], [0], [1], [0, 0, 1, 1], [], []>} : vector<8x4xf32>, vector<4x256xf32>, vector<8x256xf32> -> vector<8x256xf32>
    %52 = arith.addf %42, %51 : vector<8x256xf32>
    %c0_45 = arith.constant 0 : index
    %c0_46 = arith.constant 0 : index
    %c32 = arith.constant 32 : index
    %53 = vector.load %arg1[%c0_45, %c0_46, %c32] : memref<1x4x290xf32, #tpu.memory_space<vmem>>, vector<1x4x256xf32>
    %54 = vector.shape_cast %53 : vector<1x4x256xf32> to vector<4x256xf32>
    %c0_47 = arith.constant 0 : index
    %c0_48 = arith.constant 0 : index
    %c0_49 = arith.constant 0 : index
    %55 = vector.load %arg4[%c0_47, %c0_48, %c0_49] : memref<3x1x256xf32, #tpu.memory_space<vmem>>, vector<1x1x256xf32>
    %56 = vector.shape_cast %55 : vector<1x1x256xf32> to vector<1x256xf32>
    %57 = vector.broadcast %56 : vector<1x256xf32> to vector<4x256xf32>
    %58 = arith.mulf %54, %57 : vector<4x256xf32>
    %c6 = arith.constant 6 : index
    %c0_50 = arith.constant 0 : index
    %c0_51 = arith.constant 0 : index
    %59 = vector.load %arg2[%c6, %c0_50, %c0_51] : memref<9x8x4xf32, #tpu.memory_space<vmem>>, vector<1x8x4xf32>
    %60 = vector.shape_cast %59 : vector<1x8x4xf32> to vector<8x4xf32>
    %cst_52 = arith.constant dense<0.000000e+00> : vector<8x256xf32>
    %61 = tpu.matmul %60, %58, %cst_52 {dimension_numbers = #tpu.dot_dimension_numbers<[1], [0], [0], [1], [0, 0, 1, 1], [], []>} : vector<8x4xf32>, vector<4x256xf32>, vector<8x256xf32> -> vector<8x256xf32>
    %62 = arith.addf %52, %61 : vector<8x256xf32>
    %c0_53 = arith.constant 0 : index
    %c0_54 = arith.constant 0 : index
    %c33 = arith.constant 33 : index
    %63 = vector.load %arg1[%c0_53, %c0_54, %c33] : memref<1x4x290xf32, #tpu.memory_space<vmem>>, vector<1x4x256xf32>
    %64 = vector.shape_cast %63 : vector<1x4x256xf32> to vector<4x256xf32>
    %c7 = arith.constant 7 : index
    %c0_55 = arith.constant 0 : index
    %c0_56 = arith.constant 0 : index
    %65 = vector.load %arg2[%c7, %c0_55, %c0_56] : memref<9x8x4xf32, #tpu.memory_space<vmem>>, vector<1x8x4xf32>
    %66 = vector.shape_cast %65 : vector<1x8x4xf32> to vector<8x4xf32>
    %cst_57 = arith.constant dense<0.000000e+00> : vector<8x256xf32>
    %67 = tpu.matmul %66, %64, %cst_57 {dimension_numbers = #tpu.dot_dimension_numbers<[1], [0], [0], [1], [0, 0, 1, 1], [], []>} : vector<8x4xf32>, vector<4x256xf32>, vector<8x256xf32> -> vector<8x256xf32>
    %68 = arith.addf %62, %67 : vector<8x256xf32>
    %c0_58 = arith.constant 0 : index
    %c0_59 = arith.constant 0 : index
    %c34 = arith.constant 34 : index
    %69 = vector.load %arg1[%c0_58, %c0_59, %c34] : memref<1x4x290xf32, #tpu.memory_space<vmem>>, vector<1x4x256xf32>
    %70 = vector.shape_cast %69 : vector<1x4x256xf32> to vector<4x256xf32>
    %c2_60 = arith.constant 2 : index
    %c0_61 = arith.constant 0 : index
    %c0_62 = arith.constant 0 : index
    %71 = vector.load %arg4[%c2_60, %c0_61, %c0_62] : memref<3x1x256xf32, #tpu.memory_space<vmem>>, vector<1x1x256xf32>
    %72 = vector.shape_cast %71 : vector<1x1x256xf32> to vector<1x256xf32>
    %73 = vector.broadcast %72 : vector<1x256xf32> to vector<4x256xf32>
    %74 = arith.mulf %70, %73 : vector<4x256xf32>
    %c8 = arith.constant 8 : index
    %c0_63 = arith.constant 0 : index
    %c0_64 = arith.constant 0 : index
    %75 = vector.load %arg2[%c8, %c0_63, %c0_64] : memref<9x8x4xf32, #tpu.memory_space<vmem>>, vector<1x8x4xf32>
    %76 = vector.shape_cast %75 : vector<1x8x4xf32> to vector<8x4xf32>
    %cst_65 = arith.constant dense<0.000000e+00> : vector<8x256xf32>
    %77 = tpu.matmul %76, %74, %cst_65 {dimension_numbers = #tpu.dot_dimension_numbers<[1], [0], [0], [1], [0, 0, 1, 1], [], []>} : vector<8x4xf32>, vector<4x256xf32>, vector<8x256xf32> -> vector<8x256xf32>
    %78 = arith.addf %68, %77 : vector<8x256xf32>
    %c0_66 = arith.constant 0 : index
    %c0_67 = arith.constant 0 : index
    %79 = vector.load %arg3[%c0_66, %c0_67] : memref<8x1xf32, #tpu.memory_space<vmem>>, vector<8x1xf32>
    %80 = vector.broadcast %79 : vector<8x1xf32> to vector<8x256xf32>
    %81 = arith.addf %78, %80 : vector<8x256xf32>
    %cst_68 = arith.constant 0.000000e+00 : f32
    %82 = vector.broadcast %cst_68 : f32 to vector<8x256xf32>
    %83 = arith.subf %82, %81 : vector<8x256xf32>
    %84 = math.exp %83 : vector<8x256xf32>
    %cst_69 = arith.constant 1.000000e+00 : f32
    %85 = vector.broadcast %cst_69 : f32 to vector<8x256xf32>
    %86 = arith.addf %85, %84 : vector<8x256xf32>
    %87 = tpu.reciprocal %86 {approx = true} : vector<8x256xf32> -> vector<8x256xf32>
    %88 = arith.mulf %81, %87 : vector<8x256xf32>
    %c0_70 = arith.constant 0 : index
    %c0_71 = arith.constant 0 : index
    %c0_72 = arith.constant 0 : index
    %89 = vector.load %arg5[%c0_70, %c0_71, %c0_72] : memref<1x8x256xf32, #tpu.memory_space<vmem>>, vector<1x8x256xf32>
    %90 = vector.shape_cast %89 : vector<1x8x256xf32> to vector<8x256xf32>
    %91 = vector.shape_cast %88 : vector<8x256xf32> to vector<1x8x256xf32>
    tpu.vector_store %arg5[%c0_70, %c0_71, %c0_72], %91 {strides = array<i32>} : memref<1x8x256xf32, #tpu.memory_space<vmem>>, vector<1x8x256xf32>,
    return
  }
  func.func @transform_0(%arg0: i32) -> (i32, i32, i32) {
    %c0_i32 = arith.constant 0 : i32
    %c0_i32_0 = arith.constant 0 : i32
    %c0_i32_1 = arith.constant 0 : i32
    return %arg0, %c0_i32, %c0_i32_0 : i32, i32, i32
  }
  func.func @transform_1(%arg0: i32) -> (i32, i32, i32) {
    %c0_i32 = arith.constant 0 : i32
    %c0_i32_0 = arith.constant 0 : i32
    %c0_i32_1 = arith.constant 0 : i32
    %c0_i32_2 = arith.constant 0 : i32
    return %c0_i32, %c0_i32_0, %c0_i32_1 : i32, i32, i32
  }
  func.func @transform_2(%arg0: i32) -> (i32, i32) {
    %c0_i32 = arith.constant 0 : i32
    %c0_i32_0 = arith.constant 0 : i32
    %c0_i32_1 = arith.constant 0 : i32
    return %c0_i32, %c0_i32_0 : i32, i32
  }
  func.func @transform_3(%arg0: i32) -> (i32, i32, i32) {
    %c0_i32 = arith.constant 0 : i32
    %c0_i32_0 = arith.constant 0 : i32
    %c0_i32_1 = arith.constant 0 : i32
    %c0_i32_2 = arith.constant 0 : i32
    return %c0_i32, %c0_i32_0, %c0_i32_1 : i32, i32, i32
  }
  func.func @transform_4(%arg0: i32) -> (i32, i32, i32) {
    %c0_i32 = arith.constant 0 : i32
    %c0_i32_0 = arith.constant 0 : i32
    %c0_i32_1 = arith.constant 0 : i32
    return %arg0, %c0_i32, %c0_i32_0 : i32, i32, i32
  }
}

</mosaic_0001>

<bundles_post_ra>
// kernel: conv2d_silu.1
= control target key start
LH: loop header
LB: loop body
LE: loop exit
PB: predicated region body
PF: predicated region fallthrough
CT: control target
= control target key end

     0   :  { %s1324_s15 = smov 0   ;;  %s1458_s0 = inlined_call_operand.vmem [shape: f32[2,4,290], index: 0, kind: input, shape index: {}]   ;;  %s1459_s1 = inlined_call_operand.vmem [shape: f32[9,8,4], index: 1, kind: input, shape index: {}]   ;;  %s1460_s2 = inlined_call_operand.vmem [shape: f32[8,1], index: 2, kind: input, shape index: {}]   ;;  %s1461_s3 = inlined_call_operand.vmem [shape: f32[3,1,256], index: 3, kind: input, shape index: {}]   ;;  %s1462_s4 = inlined_call_operand.vmem [shape: f32[2,8,256], index: 4, kind: output, shape index: {}]  }
   0x1 LB: > { %s1194_s16 = sadd.s32 4294967295, %s1282_s15   ;;  %p1198_p0 = scmp.ge.s32.totalorder %s1282_s15, 1  ;;  %s1282_s15 = sphi %s1324_s15, %s14_s15  }
   0x2   : > { %p162_p1 = scmp.lt.s32.totalorder %s1282_s15, 3 }
   0x4   : > { %p163_p2 = pnand %p1198_p0, %p162_p1 }
   0x5   : > { %p188_p3 = scmp.lt.s32.totalorder (!%p163_p2), %s1194_s16, 1  ;;  %s1284_s25 = smov (!%p163_p2), 18  }
   0x6   : > { %166 = sbr.rel (%p163_p2) target bundleno = 529 (0x211), region = 36  ;;  %s1285_s26 = smov (!%p163_p2), 2  }
   0x7   : > { %s1286_s27 = smov (!%p163_p2), 32   ;;  %s1287_s28 = smov (!%p163_p2), 16  }
   0x8   : > { %s1288_s29 = smov (!%p163_p2), 34   ;;  %s1289_s30 = smov (!%p163_p2), 127  }
   0x9   : > { %s1290_s5 = smov (!%p163_p2), 111   ;;  %s1291_s6 = smov (!%p163_p2), 95  }
   0xa   : > { %s1292_s7 = smov (!%p163_p2), 126   ;;  %s1293_s8 = smov (!%p163_p2), 112  }
   0xb   : > { %v201_v0 = vlaneseq  ;;  %v1209_v2 = vld [vmem:[%s1461_s3 + $0x4] sm:$0x3]  ;;  %v199_v3 = vld [vmem:[%s1461_s3] sm:$0x3]  ;;  %s1464_s16 = smov (!%p188_p3, %s1194_s16), 1  ;;  %vm510_vm0 = vcmask 130048  }
   0xc   : > { %s1241_s21 = smul.u32 12, %s1464_s16  ;;  %vm232_vm1 = vcmask 1043456   ;;  %vm711_vm2 = vcmask 146432   ;;  %vm405_vm3 = vcmask 15360   ;;  %s1294_s9 = smov 96   ;;  %v212_v37 = vld [vmem:[%s1459_s1] sm:$0xff] }
   0xd   : > { %v202_v1 = vshrl.u32 %v201_v0, 7  ;;  %vm228_vm4 = vcmask 31744   ;;  %vm225_vm5 = vcmask 1039360   ;;  %v1295_v38 = vmov 0.0   ;;  %s1296_s12 = smov 110   ;;  %v1202_v46 = vld [vmem:[%s1459_s1 + $0x8] sm:$0xff] }
   0xe   : > { %s1344_s24 = scalar_lea.vmem %s1458_s0, %s1241_s21  ;;  %381 = vmatprep.mubr.f32.mxu1 %v1295_v38  ;;  %301 = vmatprep.mubr.f32.mxu0 %v1295_v38  ;;  %vm816_vm6 = vcmask 261120   ;;  %vm1017_vm7 = vcmask 277504   ;;  %v1297_v61 = vmov 0   ;;  %s1298_s17 = smov 94   ;;  %v1117_v62 = vld [vmem:[%s1460_s2] sm:$0xff]  ;;  %vm527_vm8 = vcmask 916480  }
   0xf   : > { %v203_v4 = vsub.s32 0, %v202_v1  ;;  %v207_v5 = vsub.s32 1, %v202_v1  ;;  %v1347_v12 = vld [vmem:[%s1344_s24] sm:$0xff]  ;;  %v213_v14 = vld [vmem:[%s1344_s24 + $0x8] sm:$0xf]  ;;  %1265 = vset.pattern.permute.xlu1 %v1297_v61  ;;  %1266 = vset.pattern.permute.xlu0 %v1297_v61  ;;  %vm422_vm9 = vcmask 1031168  }
  0x10   : > { %v218_v13 = vcombine.high %v1347_v12, %v1347_v12  ;;  %v611_v15 = vld [vmem:[%s1344_s24 + $0x8] sm:$0xf]  ;;  %vm728_vm10 = vcmask 900096   ;;  %vm623_vm11 = vcmask 908288   ;;  %vm929_vm12 = vcmask 777216  }
  0x11   : > { %v396_v6 = vrot.slane %v1209_v2, %v203_v4  ;;  %v400_v7 = vrot.slane %v1209_v2, %v207_v5  ;;  %v204_v8 = vrot.slane %v199_v3, %v203_v4  ;;  %v208_v9 = vrot.slane %v199_v3, %v207_v5  ;;  %v389_v18 = vld [vmem:[%s1344_s24 + $0x8] sm:$0xf] }
  0x12   : > { %v812_v22 = vld [vmem:[%s1344_s24 + $0x8] sm:$0xf]  ;;  %vm833_vm13 = vcmask 785408   ;;  %vm1034_vm14 = vcmask 769024  }
  0x13   : > { %v401_v10 = vcombine.low %v396_v6, %v400_v7  ;;  %v209_v11 = vcombine.low %v204_v8, %v208_v9  ;;  %v506_v24 = vld [vmem:[%s1344_s24 + $0x8] sm:$0xf] }
  0x14   : > { %v707_v28 = vld [vmem:[%s1344_s24 + $0x8] sm:$0xf] }
  0x15   : > { %708 = vrot.lane.b32.xlu1 %v401_v10, %s1284_s25  ;;  %402 = vrot.lane.b32.xlu0 %v401_v10, %s1285_s26  ;;  %v211_v25 = vmul.f32 %v209_v11, %v1347_v12  ;;  %v1013_v55 = vld [vmem:[%s1344_s24 + $0x8] sm:$0xf] }
  0x16   : > { %v917_v56 = vld [vmem:[%s1344_s24 + $0x8] sm:$0xf] }
  0x17   : > { %v309_v29 = vcombine.high %v211_v25, %v211_v25 }
  0x19   : > { %813 = vrot.lane.b32.xlu1 %v209_v11, %s1286_s27  ;;  %507 = vrot.lane.b32.xlu0 %v209_v11, %s1287_s28 }
  0x1a   : > { %1206 = vmatprep.subr.msk.mxu1 %vm232_vm1, %v309_v29 }
  0x1b   : > { %1207 = vmatpush1.msk.msra.mxu1 %vm232_vm1, %v211_v25 }
  0x1c   : > { %1208 = vmatmul.mubr.msk.f32.vlgmr.msra.gmra.mxu1 %vm228_vm4, %v212_v37 }
  0x1d   : > { %1014 = vrot.lane.b32.xlu0 %v401_v10, %s1288_s29  ;;  %221 = vrot.lane.b32.xlu1 %v218_v13, %s1289_s30 }
  0x1e   : > { %601 = vmatprep.mubr.f32.mxu1 %v1295_v38 }
  0x21   : > { %223 = vrot.lane.b32.xlu0 %v213_v14, %s1289_s30  ;;  %219 = vrot.lane.b32.xlu1 %v1347_v12, %s1289_s30 }
  0x25   : > { %619 = vrot.lane.b32.xlu0 %v218_v13, %s1290_s5  ;;  %621 = vrot.lane.b32.xlu1 %v611_v15, %s1290_s5  ;;  %v1214_v15 = vld [vmem:[%s1459_s1 + $0x18] sm:$0xff] }
  0x29   : > { %617 = vrot.lane.b32.xlu0 %v1347_v12, %s1290_s5  ;;  %925 = vrot.lane.b32.xlu1 %v218_v13, %s1291_s6 }
  0x87   : > { %v709_v16 = vpop.permute.xlu1 %708  ;;  %v403_v17 = vpop.permute.xlu0 %402 }
  0x88   : > { %v404_v19 = vrot.slane %v403_v17, 4  ;;  %v710_v30 = vrot.slane %v709_v16, 4 }
  0x8a   : > { %v410_v20 = vmul.f32 %v404_v19, %v389_v18  ;;  %v716_v36 = vmul.f32 %v710_v30, %v707_v28  ;;  %v712_v40 = vsel %vm711_vm2, %v710_v30, %v709_v16  ;;  %v406_v41 = vsel %vm405_vm3, %v404_v19, %v403_v17  ;;  %v1218_v30 = vld [vmem:[%s1459_s1 + $0x20] sm:$0xff] }
  0x8b   : > { %v814_v21 = vpop.permute.xlu1 %813  ;;  %v508_v23 = vpop.permute.xlu0 %507  ;;  %v715_v47 = vmul.f32 %v712_v40, %v1347_v12  ;;  %v409_v48 = vmul.f32 %v406_v41, %v1347_v12  ;;  %v1234_v41 = vld [vmem:[%s1459_s1 + $0x40] sm:$0xff] }
  0x8c   : > { %v815_v26 = vrot.slane %v814_v21, 4  ;;  %v509_v27 = vrot.slane %v508_v23, 4  ;;  %420 = vrot.lane.b32.xlu1 %v410_v20, %s1292_s7 }
  0x8d   : > { %v415_v52 = vcombine.high %v409_v48, %v409_v48  ;;  %v721_v53 = vcombine.high %v715_v47, %v715_v47 }
  0x8e   : > { %v821_v31 = vmul.f32 %v815_v26, %v812_v22  ;;  %v515_v32 = vmul.f32 %v509_v27, %v506_v24  ;;  %v511_v33 = vsel %vm510_vm0, %v509_v27, %v508_v23  ;;  %v817_v49 = vsel %vm816_vm6, %v815_v26, %v814_v21  ;;  %v1210_v22 = vld [vmem:[%s1459_s1 + $0x10] sm:$0xff]  ;;  %v1222_v23 = vld [vmem:[%s1459_s1 + $0x28] sm:$0xff] }
  0x8f   : > { %v1015_v34 = vpop.permute.xlu0 %1014  ;;  %v222_v35 = vpop.permute.xlu1 %221  ;;  %v514_v39 = vmul.f32 %v511_v33, %v1347_v12  ;;  %v820_v50 = vmul.f32 %v817_v49, %v1347_v12 }
  0x90   : > { %525 = vrot.lane.b32.xlu0 %v515_v32, %s1293_s8  ;;  %831 = vrot.lane.b32.xlu1 %v821_v31, %s1294_s9  ;;  %v1016_v54 = vrot.slane %v1015_v34, 4  ;;  %v1230_v31 = vld [vmem:[%s1459_s1 + $0x38] sm:$0xff] }
  0x91   : > { %v520_v51 = vcombine.high %v514_v39, %v514_v39  ;;  %v826_v60 = vcombine.high %v820_v50, %v820_v50 }
  0x92   : > { %v1018_v57 = vsel %vm1017_vm7, %v1016_v54, %v1015_v34  ;;  %v1022_v58 = vmul.f32 %v1016_v54, %v1013_v55 }
  0x93   : > { %v224_v42 = vpop.permute.xlu0 %223  ;;  %v220_v43 = vpop.permute.xlu1 %219  ;;  %v1021_v59 = vmul.f32 %v1018_v57, %v1347_v12 }
  0x94   : > { %726 = vrot.lane.b32.xlu0 %v716_v36, %s1296_s12  ;;  %521 = vrot.lane.b32.xlu1 %v514_v39, %s1293_s8  ;;  %v227_v44 = vsel %vm225_vm5, %v222_v35, %v224_v42  ;;  %v226_v45 = vsel %vm225_vm5, %v220_v43, %v222_v35  ;;  %v1226_v35 = vld [vmem:[%s1459_s1 + $0x30] sm:$0xff] }
  0x95   : > { %1203 = vmatprep.subr.msk.mxu0 %vm232_vm1, %v227_v44  ;;  %v1027_v63 = vcombine.high %v1021_v59, %v1021_v59 }
  0x96   : > { %1204 = vmatpush1.msk.msra.mxu0 %vm232_vm1, %v226_v45 }
  0x97   : > { %1205 = vmatmul.mubr.msk.f32.vlgmr.msra.gmra.mxu0 %vm228_vm4, %v1202_v46  ;;  %v622_v0 = vpop.permute.xlu1 %621  ;;  %v620_v1 = vpop.permute.xlu0 %619 }
  0x98   : > { %416 = vrot.lane.b32.xlu0 %v409_v48, %s1292_s7  ;;  %722 = vrot.lane.b32.xlu1 %v715_v47, %s1296_s12  ;;  %v625_v24 = vsel %vm623_vm11, %v620_v1, %v622_v0 }
  0x99   : > { %496 = vmatprep.mubr.f32.mxu0 %v1295_v38 }
  0x9b   : > { %v926_v2 = vpop.permute.xlu1 %925  ;;  %v618_v3 = vpop.permute.xlu0 %617 }
  0x9c   : > { %827 = vrot.lane.b32.xlu0 %v820_v50, %s1294_s9  ;;  %523 = vrot.lane.b32.xlu1 %v520_v51, %s1293_s8  ;;  %v624_v25 = vsel %vm623_vm11, %v618_v3, %v620_v1  ;;  %s1240_s8 = sshll.u32 %s1464_s16, 4 }
  0x9d   : > { %s197_s11 = scalar_lea.vmem %s1462_s4, %s1240_s8 }
  0xa0   : > { %418 = vrot.lane.b32.xlu0 %v415_v52, %s1292_s7  ;;  %724 = vrot.lane.b32.xlu1 %v721_v53, %s1296_s12 }
  0xa4   : > { %927 = vrot.lane.b32.xlu0 %v917_v56, %s1291_s6  ;;  %923 = vrot.lane.b32.xlu1 %v1347_v12, %s1291_s6 }
  0xa8   : > { %829 = vrot.lane.b32.xlu0 %v826_v60, %s1294_s9  ;;  %1032 = vrot.lane.b32.xlu1 %v1022_v58, %s1298_s17 }
  0xac   : > { %1030 = vrot.lane.b32.xlu0 %v1027_v63, %s1298_s17  ;;  %1120 = vperm.xlu1 %1265, %v1117_v62  }
  0xb0   : > { %1028 = vrot.lane.b32.xlu0 %v1021_v59, %s1298_s17 }
  0xdc   : > { %v383_v43 = vpop.f32.mrf.mxu1 }
  0xde   : > { %v385_v45 = vpop.f32.mrf.mxu1 }
  0xfe   : > { %v421_v4 = vpop.permute.xlu1 %420 }
 0x102   : > { %v526_v5 = vpop.permute.xlu0 %525  ;;  %v832_v6 = vpop.permute.xlu1 %831 }
 0x106   : > { %v727_v7 = vpop.permute.xlu0 %726  ;;  %v522_v8 = vpop.permute.xlu1 %521 }
 0x10a   : > { %v417_v9 = vpop.permute.xlu0 %416  ;;  %v723_v10 = vpop.permute.xlu1 %722 }
 0x10e   : > { %v828_v11 = vpop.permute.xlu0 %827  ;;  %v524_v12 = vpop.permute.xlu1 %523 }
 0x10f   : > { %v528_v13 = vsel %vm527_vm8, %v522_v8, %v524_v12  ;;  %v529_v14 = vsel %vm527_vm8, %v524_v12, %v526_v5 }
 0x110   : > { %1215 = vmatprep.subr.msk.mxu1 %vm232_vm1, %v529_v14 }
 0x111   : > { %1216 = vmatpush1.msk.msra.mxu1 %vm232_vm1, %v528_v13 }
 0x112   : > { %v419_v16 = vpop.permute.xlu0 %418  ;;  %v725_v17 = vpop.permute.xlu1 %724  ;;  %1217 = vmatmul.mubr.msk.f32.vlgmr.msra.gmra.mxu1 %vm228_vm4, %v1214_v15 }
 0x113   : > { %v423_v18 = vsel %vm422_vm9, %v417_v9, %v419_v16  ;;  %v424_v19 = vsel %vm422_vm9, %v419_v16, %v421_v4  ;;  %v729_v20 = vsel %vm728_vm10, %v723_v10, %v725_v17  ;;  %v730_v21 = vsel %vm728_vm10, %v725_v17, %v727_v7  ;;  %802 = vmatprep.mubr.f32.mxu1 %v1295_v38 }
 0x114   : > { %1211 = vmatprep.subr.msk.mxu0 %vm232_vm1, %v424_v19  ;;  %1223 = vmatprep.subr.msk.mxu1 %vm232_vm1, %v730_v21 }
 0x115   : > { %1212 = vmatpush1.msk.msra.mxu0 %vm232_vm1, %v423_v18  ;;  %1224 = vmatpush1.msk.msra.mxu1 %vm232_vm1, %v729_v20 }
 0x116   : > { %v928_v26 = vpop.permute.xlu0 %927  ;;  %1219 = vmatprep.subr.msk.mxu0 %vm232_vm1, %v625_v24  ;;  %v924_v27 = vpop.permute.xlu1 %923  ;;  %1213 = vmatmul.mubr.msk.f32.vlgmr.msra.gmra.mxu0 %vm228_vm4, %v1210_v22 }
 0x117   : > { %v931_v28 = vsel %vm929_vm12, %v926_v2, %v928_v26  ;;  %v930_v29 = vsel %vm929_vm12, %v924_v27, %v926_v2  ;;  %1220 = vmatpush1.msk.msra.mxu0 %vm232_vm1, %v624_v25  ;;  %1225 = vmatmul.mubr.msk.f32.vlgmr.msra.gmra.mxu1 %vm228_vm4, %v1222_v23 }
 0x118   : > { %1231 = vmatprep.subr.msk.mxu1 %vm232_vm1, %v931_v28  ;;  %697 = vmatprep.mubr.f32.mxu0 %v1295_v38 }
 0x119   : > { %1232 = vmatpush1.msk.msra.mxu1 %vm232_vm1, %v930_v29  ;;  %1003 = vmatprep.mubr.f32.mxu1 %v1295_v38 }
 0x11a   : > { %v830_v32 = vpop.permute.xlu0 %829  ;;  %1221 = vmatmul.mubr.msk.f32.vlgmr.msra.gmra.mxu0 %vm228_vm4, %v1218_v30  ;;  %v1033_v36 = vpop.permute.xlu1 %1032 }
 0x11b   : > { %v834_v33 = vsel %vm833_vm13, %v828_v11, %v830_v32  ;;  %v835_v34 = vsel %vm833_vm13, %v830_v32, %v832_v6  ;;  %907 = vmatprep.mubr.f32.mxu0 %v1295_v38  ;;  %1233 = vmatmul.mubr.msk.f32.vlgmr.msra.gmra.mxu1 %vm228_vm4, %v1230_v31 }
 0x11c   : > { %1227 = vmatprep.subr.msk.mxu0 %vm232_vm1, %v835_v34 }
 0x11d   : > { %1228 = vmatpush1.msk.msra.mxu0 %vm232_vm1, %v834_v33 }
 0x11e   : > { %v1031_v37 = vpop.permute.xlu0 %1030  ;;  %1229 = vmatmul.mubr.msk.f32.vlgmr.msra.gmra.mxu0 %vm228_vm4, %v1226_v35 }
 0x11f   : > { %v1036_v39 = vsel %vm1034_vm14, %v1031_v37, %v1033_v36  ;;  %1108 = vmatprep.mubr.f32.mxu0 %v1295_v38 }
 0x120   : > { %1235 = vmatprep.subr.msk.mxu0 %vm232_vm1, %v1036_v39 }
 0x122   : > { %v1029_v40 = vpop.permute.xlu0 %1028 }
 0x123   : > { %v1035_v42 = vsel %vm1034_vm14, %v1029_v40, %v1031_v37 }
 0x124   : > { %1236 = vmatpush1.msk.msra.mxu0 %vm232_vm1, %v1035_v42 }
 0x125   : > { %1237 = vmatmul.mubr.msk.f32.vlgmr.msra.gmra.mxu0 %vm228_vm4, %v1234_v41 }
 0x127   : > { %v1121_v8 = vpop.permute.xlu1 %1120 }
 0x157   : > { %v303_v44 = vpop.f32.mrf.mxu0 }
 0x158   : > { %v384_v48 = vadd.f32 %v383_v43, %v303_v44 }
 0x159   : > { %v305_v46 = vpop.f32.mrf.mxu0 }
 0x15a   : > { %v386_v38 = vadd.f32 %v385_v45, %v305_v46 }
 0x1d2   : > { %v603_v47 = vpop.f32.mrf.mxu1 }
 0x1d4   : > { %v605_v49 = vpop.f32.mrf.mxu1 }
 0x1d6   : > { %v498_v50 = vpop.f32.mrf.mxu0 }
 0x1d7   : > { %v503_v51 = vadd.f32 %v498_v50, %v384_v48  ;;  %v804_v52 = vpop.f32.mrf.mxu1 }
 0x1d8   : > { %v500_v53 = vpop.f32.mrf.mxu0 }
 0x1d9   : > { %v504_v54 = vadd.f32 %v500_v53, %v386_v38  ;;  %v608_v55 = vadd.f32 %v603_v47, %v503_v51  ;;  %v806_v59 = vpop.f32.mrf.mxu1 }
 0x1da   : > { %v699_v56 = vpop.f32.mrf.mxu0 }
 0x1db   : > { %v609_v57 = vadd.f32 %v605_v49, %v504_v54  ;;  %v704_v58 = vadd.f32 %v699_v56, %v608_v55  ;;  %v1005_v1 = vpop.f32.mrf.mxu1 }
 0x1dc   : > { %v701_v60 = vpop.f32.mrf.mxu0 }
 0x1dd   : > { %v705_v61 = vadd.f32 %v701_v60, %v609_v57  ;;  %v809_v62 = vadd.f32 %v804_v52, %v704_v58  ;;  %v1007_v5 = vpop.f32.mrf.mxu1 }
 0x1de   : > { %v909_v63 = vpop.f32.mrf.mxu0 }
 0x1df   : > { %v810_v0 = vadd.f32 %v806_v59, %v705_v61  ;;  %v914_v2 = vadd.f32 %v909_v63, %v809_v62 }
 0x1e0   : > { %v911_v3 = vpop.f32.mrf.mxu0 }
 0x1e1   : > { %v915_v4 = vadd.f32 %v911_v3, %v810_v0  ;;  %v1010_v6 = vadd.f32 %v1005_v1, %v914_v2 }
 0x1e3   : > { %v1011_v9 = vadd.f32 %v1007_v5, %v915_v4 }
 0x1e5   : > { %v1110_v7 = vpop.f32.mrf.mxu0 }
 0x1e6   : > { %v1115_v10 = vadd.f32 %v1110_v7, %v1010_v6 }
 0x1e7   : > { %v1112_v11 = vpop.f32.mrf.mxu0 }
 0x1e8   : > { %v1116_v12 = vadd.f32 %v1112_v11, %v1011_v9  ;;  %v1123_v13 = vadd.f32 %v1121_v8, %v1115_v10 }
 0x1ea   : > { %v1124_v14 = vadd.f32 %v1121_v8, %v1116_v12  ;;  %v1125_v15 = vsub.f32 0.0, %v1123_v13 }
 0x1ec   : > { %v1126_v16 = vsub.f32 0.0, %v1124_v14  ;;  %v1127_v17 = vmul.f32 1.442695, %v1125_v15 }
 0x1ee   : > { %1268 = vpow2.f32 %v1127_v17  ;;  %v1129_v18 = vmul.f32 1.442695, %v1126_v16 }
 0x1f0   : > { %1270 = vpow2.f32 %v1129_v18 }
 0x1fb   : > { %v1269_v19 = vpop.eup %1268 }
 0x1fc   : > { %v1131_v20 = vadd.f32 1.0, %v1269_v19 }
 0x1fd   : > { %v1271_v21 = vpop.eup %1270 }
 0x1fe   : > { %v1132_v22 = vadd.f32 1.0, %v1271_v21  ;;  %1272 = vrcp.f32 %v1131_v20 }
 0x200   : > { %1274 = vrcp.f32 %v1132_v22 }
 0x20b   : > { %v1273_v23 = vpop.eup %1272 }
 0x20c   : > { %v1135_v24 = vmul.f32 %v1273_v23, %v1123_v13 }
 0x20d   : > { %v1275_v25 = vpop.eup %1274 }
 0x20e   : > { %v1136_v26 = vmul.f32 %v1275_v25, %v1124_v14  ;;  %1137 = vst [vmem:[%s197_s11] sm:$0xff] %v1135_v24 }
 0x210   : > { %1138 = vst [vmem:[%s197_s11 + $0x8] sm:$0xff] %v1136_v26 }
 0x211 PF: > { %s14_s15 = sadd.s32 1, %s1282_s15  }
 0x212   : > { %p11_p4 = scmp.ge.s32.totalorder %s14_s15, 4  }
 0x214   :  { %13 = sbr.rel (!%p11_p4) target bundleno = 1 (0x1), region = 75 }

</bundles_post_ra>
